<compile_context>
chip_gen: v7x
topology: tpu7x:2x2x1
jax: 0.10.0
libtpu: 0.0.40
codegen_flags: <defaults>
</compile_context>

<pallas_src>
import functools

import jax
import jax.numpy as jnp
from jax.experimental import pallas as pl
from jax.experimental.pallas import tpu as pltpu

# Logical (PyTorch) layer sizes and lane-padded sizes used by the kernel.
_DIMS_RAW = (16, 400, 256, 128, 26)
_DIMS_PAD = (16, 512, 256, 128, 128)


def _round_up(x, m):
    return (x + m - 1) // m * m


def _pad_to(arr, shape):
    pads = [(0, s - d) for d, s in zip(arr.shape, shape)]
    return jnp.pad(arr, pads)


def mlp_kernel(x_ref,
               w1_ref, b1_ref,
               w2_ref, b2_ref,
               w3_ref, b3_ref,
               w4_ref, b4_ref,
               out_ref):
    """Fused 4-layer MLP forward: relu(relu(relu(x@W1+b1)@W2+b2)@W3+b3)@W4+b4.

    Matmuls run in the weight dtype (f32 or bf16) with f32 accumulation on the
    MXU; bias add and ReLU run in f32 on the VPU.
    """
    cdt = w1_ref.dtype  # compute dtype for MXU inputs (f32 or bf16)
    x = x_ref[...].astype(cdt)

    h = jnp.dot(x, w1_ref[...], preferred_element_type=jnp.float32) + b1_ref[...]
    h = jnp.maximum(h, 0.0).astype(cdt)

    h = jnp.dot(h, w2_ref[...], preferred_element_type=jnp.float32) + b2_ref[...]
    h = jnp.maximum(h, 0.0).astype(cdt)

    h = jnp.dot(h, w3_ref[...], preferred_element_type=jnp.float32) + b3_ref[...]
    h = jnp.maximum(h, 0.0).astype(cdt)

    h = jnp.dot(h, w4_ref[...], preferred_element_type=jnp.float32) + b4_ref[...]
    out_ref[...] = h.astype(out_ref.dtype)


def prepare_params(params, param_dtype=jnp.float32):
    """Pad weights/biases to lane-aligned shapes; cast weights to param_dtype."""
    out = []
    for layer in range(4):
        d_in_p, d_out_p = _DIMS_PAD[layer], _DIMS_PAD[layer + 1]
        w = _pad_to(params[f"w{layer + 1}"], (d_in_p, d_out_p)).astype(param_dtype)
        b = _pad_to(params[f"b{layer + 1}"], (1, d_out_p)).astype(jnp.float32)
        out.extend((w, b))
    return tuple(out)


def _pick_batch_tile(B, batch_tile):
    """Choose the batch tile.

    - tiny/medium batches: one grid step (no pipeline overhead);
    - batches big enough for >= 2 full tiles: use `batch_tile` (keeps v7x's
      second TensorCore busy and lets double-buffering hide activation DMA);
    - in-between: split into two roughly equal, 8-aligned tiles.
    """
    B8 = _round_up(max(B, 1), 8)
    if B8 >= 2 * batch_tile:
        return batch_tile
    if B8 > 256:
        return _round_up(pl.cdiv(B8, 2), 8)
    return B8


@functools.partial(jax.jit, static_argnames=("batch_tile", "param_dtype"))
def net_forward(t, params, *, batch_tile=512, param_dtype=jnp.float32):
    """Pallas-backed forward pass of `Net`.

    t: (B, 16) float32
    params: dict with w1..w4 of shape (in, out) and b1..b4 of shape (1, out)
    returns: (B, 26) float32 logits
    """
    B, D_in = t.shape
    assert D_in == _DIMS_RAW[0]
    D_out_raw = _DIMS_RAW[-1]
    D_out_pad = _DIMS_PAD[-1]

    prepared = prepare_params(params, param_dtype)

    tile = _pick_batch_tile(B, batch_tile)
    B_padded = _round_up(B, tile)
    if B_padded != B:
        t = jnp.pad(t, ((0, B_padded - B), (0, 0)))
    grid = (B_padded // tile,)

    # Weights/biases fit comfortably in VMEM (< 1 MiB total), so every grid
    # step sees the full, resident weight set; only the batch dim is tiled.
    # Constant index maps mean Pallas only DMAs each weight block once.
    def full_spec(arr):
        return pl.BlockSpec(arr.shape, lambda i: (0,) * arr.ndim)

    in_specs = [pl.BlockSpec((tile, D_in), lambda i: (i, 0))]
    in_specs += [full_spec(a) for a in prepared]

    flops = 2 * B_padded * sum(_DIMS_PAD[i] * _DIMS_PAD[i + 1] for i in range(4))
    weight_bytes = sum(int(a.size) * a.dtype.itemsize for a in prepared)
    bytes_accessed = B_padded * (D_in + D_out_pad) * 4 + weight_bytes

    out_padded = pl.pallas_call(
        mlp_kernel,
        out_shape=jax.ShapeDtypeStruct((B_padded, D_out_pad), jnp.float32),
        grid_spec=pltpu.PrefetchScalarGridSpec(
            num_scalar_prefetch=0,
            grid=grid,
            in_specs=in_specs,
            out_specs=pl.BlockSpec((tile, D_out_pad), lambda i: (i, 0)),
        ),
        compiler_params=pltpu.CompilerParams(
            dimension_semantics=("parallel",),
        ),
        cost_estimate=pl.CostEstimate(
            flops=int(flops),
            transcendentals=0,
            bytes_accessed=int(bytes_accessed),
        ),
    )(t, *prepared)

    return out_padded[:B, :D_out_raw]


def init_params(key):
    """Deterministic parameter init matching nn.Linear shapes (stored transposed)."""
    params = {}
    for idx in range(4):
        fan_in, fan_out = _DIMS_RAW[idx], _DIMS_RAW[idx + 1]
        key, kw, kb = jax.random.split(key, 3)
        bound = 1.0 / jnp.sqrt(fan_in)
        # PyTorch Linear default: U(-1/sqrt(fan_in), 1/sqrt(fan_in))
        w = jax.random.uniform(kw, (fan_in, fan_out), jnp.float32, -bound, bound)
        b = jax.random.uniform(kb, (1, fan_out), jnp.float32, -bound, bound)
        params[f"w{idx + 1}"] = w
        params[f"b{idx + 1}"] = b
    return params


def reference_forward(t, params):
    """Plain-JAX reference for correctness checking."""
    x = jnp.maximum(t @ params["w1"] + params["b1"], 0.0)
    x = jnp.maximum(x @ params["w2"] + params["b2"], 0.0)
    x = jnp.maximum(x @ params["w3"] + params["b3"], 0.0)
    return x @ params["w4"] + params["b4"]


if __name__ == "__main__":
    key = jax.random.PRNGKey(0)
    key, kx1, kx2, kx3 = jax.random.split(key, 4)
    params = init_params(key)

    # 1) Tiny batch (B=2, below a sublane), f32 weights — tight tolerance.
    B1 = 2
    t1 = jax.random.normal(kx1, (B1, 16), jnp.float32)
    out1 = jax.block_until_ready(net_forward(t1, params))
    ref1 = reference_forward(t1, params)
    assert out1.shape == (B1, 26), out1.shape
    assert jnp.allclose(out1, ref1, atol=1e-4, rtol=1e-4), float(jnp.abs(out1 - ref1).max())

    # 2) Sublane-aligned batch, f32 weights — tight tolerance.
    B2 = 8
    t2 = jax.random.normal(kx2, (B2, 16), jnp.float32)
    out2 = jax.block_until_ready(net_forward(t2, params))
    ref2 = reference_forward(t2, params)
    assert out2.shape == (B2, 26), out2.shape
    assert jnp.allclose(out2, ref2, atol=1e-4, rtol=1e-4), float(jnp.abs(out2 - ref2).max())

    # 3) Ragged batch (not a multiple of 8), bf16 weights/activations with f32
    #    accumulation — looser tolerance.
    B3 = 37
    t3 = jax.random.normal(kx3, (B3, 16), jnp.float32)
    out3 = jax.block_until_ready(
        net_forward(t3, params, param_dtype=jnp.bfloat16))
    ref3 = reference_forward(t3, params)
    assert out3.shape == (B3, 26), out3.shape
    assert jnp.allclose(out3, ref3, atol=3e-2, rtol=3e-2), float(jnp.abs(out3 - ref3).max())

    print("KERNEL_OK")
</pallas_src>

<mosaic_0001>
module attributes {stable_mosaic.version = 11 : i64} {
  func.func @mlp_kernel(%arg0: i32, %arg1: memref<8x16xf32, #tpu.memory_space<vmem>>, %arg2: memref<16x512xf32, #tpu.memory_space<vmem>>, %arg3: memref<1x512xf32, #tpu.memory_space<vmem>>, %arg4: memref<512x256xf32, #tpu.memory_space<vmem>>, %arg5: memref<1x256xf32, #tpu.memory_space<vmem>>, %arg6: memref<256x128xf32, #tpu.memory_space<vmem>>, %arg7: memref<1x128xf32, #tpu.memory_space<vmem>>, %arg8: memref<128x128xf32, #tpu.memory_space<vmem>>, %arg9: memref<1x128xf32, #tpu.memory_space<vmem>>, %arg10: memref<8x128xf32, #tpu.memory_space<vmem>>) attributes {dimension_semantics = [#tpu.dimension_semantics<parallel>], iteration_bounds = array<i64: 1>, scalar_prefetch = 0 : i64, scratch_operands = 0 : i64, tpu.core_type = #tpu.core_type<tc>, window_params = [{transform_indices = @transform_0, window_bounds = array<i64: 8, 16>}, {pipeline_mode = #tpu.pipeline_mode<synchronous>, transform_indices = @transform_1, window_bounds = array<i64: 16, 512>}, {pipeline_mode = #tpu.pipeline_mode<synchronous>, transform_indices = @transform_2, window_bounds = array<i64: 1, 512>}, {pipeline_mode = #tpu.pipeline_mode<synchronous>, transform_indices = @transform_3, window_bounds = array<i64: 512, 256>}, {pipeline_mode = #tpu.pipeline_mode<synchronous>, transform_indices = @transform_4, window_bounds = array<i64: 1, 256>}, {pipeline_mode = #tpu.pipeline_mode<synchronous>, transform_indices = @transform_5, window_bounds = array<i64: 256, 128>}, {pipeline_mode = #tpu.pipeline_mode<synchronous>, transform_indices = @transform_6, window_bounds = array<i64: 1, 128>}, {pipeline_mode = #tpu.pipeline_mode<synchronous>, transform_indices = @transform_7, window_bounds = array<i64: 128, 128>}, {pipeline_mode = #tpu.pipeline_mode<synchronous>, transform_indices = @transform_8, window_bounds = array<i64: 1, 128>}, {transform_indices = @transform_9, window_bounds = array<i64: 8, 128>}]} {
    %c0 = arith.constant 0 : index
    %c0_0 = arith.constant 0 : index
    %0 = vector.load %arg1[%c0, %c0_0] : memref<8x16xf32, #tpu.memory_space<vmem>>, vector<8x16xf32>
    %c0_1 = arith.constant 0 : index
    %c0_2 = arith.constant 0 : index
    %1 = vector.load %arg2[%c0_1, %c0_2] : memref<16x512xf32, #tpu.memory_space<vmem>>, vector<16x512xf32>
    %cst = arith.constant dense<0.000000e+00> : vector<8x512xf32>
    %2 = tpu.matmul %0, %1, %cst {dimension_numbers = #tpu.dot_dimension_numbers<[1], [0], [0], [1], [0, 0, 1, 1], [], []>} : vector<8x16xf32>, vector<16x512xf32>, vector<8x512xf32> -> vector<8x512xf32>
    %c0_3 = arith.constant 0 : index
    %c0_4 = arith.constant 0 : index
    %3 = vector.load %arg3[%c0_3, %c0_4] : memref<1x512xf32, #tpu.memory_space<vmem>>, vector<1x512xf32>
    %4 = vector.broadcast %3 : vector<1x512xf32> to vector<8x512xf32>
    %5 = arith.addf %2, %4 : vector<8x512xf32>
    %cst_5 = arith.constant 0.000000e+00 : f32
    %6 = vector.broadcast %cst_5 : f32 to vector<8x512xf32>
    %7 = arith.maximumf %5, %6 : vector<8x512xf32>
    %c0_6 = arith.constant 0 : index
    %c0_7 = arith.constant 0 : index
    %8 = vector.load %arg4[%c0_6, %c0_7] : memref<512x256xf32, #tpu.memory_space<vmem>>, vector<512x256xf32>
    %cst_8 = arith.constant dense<0.000000e+00> : vector<8x256xf32>
    %9 = tpu.matmul %7, %8, %cst_8 {dimension_numbers = #tpu.dot_dimension_numbers<[1], [0], [0], [1], [0, 0, 1, 1], [], []>} : vector<8x512xf32>, vector<512x256xf32>, vector<8x256xf32> -> vector<8x256xf32>
    %c0_9 = arith.constant 0 : index
    %c0_10 = arith.constant 0 : index
    %10 = vector.load %arg5[%c0_9, %c0_10] : memref<1x256xf32, #tpu.memory_space<vmem>>, vector<1x256xf32>
    %11 = vector.broadcast %10 : vector<1x256xf32> to vector<8x256xf32>
    %12 = arith.addf %9, %11 : vector<8x256xf32>
    %cst_11 = arith.constant 0.000000e+00 : f32
    %13 = vector.broadcast %cst_11 : f32 to vector<8x256xf32>
    %14 = arith.maximumf %12, %13 : vector<8x256xf32>
    %c0_12 = arith.constant 0 : index
    %c0_13 = arith.constant 0 : index
    %15 = vector.load %arg6[%c0_12, %c0_13] : memref<256x128xf32, #tpu.memory_space<vmem>>, vector<256x128xf32>
    %cst_14 = arith.constant dense<0.000000e+00> : vector<8x128xf32>
    %16 = tpu.matmul %14, %15, %cst_14 {dimension_numbers = #tpu.dot_dimension_numbers<[1], [0], [0], [1], [0, 0, 1, 1], [], []>} : vector<8x256xf32>, vector<256x128xf32>, vector<8x128xf32> -> vector<8x128xf32>
    %c0_15 = arith.constant 0 : index
    %c0_16 = arith.constant 0 : index
    %17 = vector.load %arg7[%c0_15, %c0_16] : memref<1x128xf32, #tpu.memory_space<vmem>>, vector<1x128xf32>
    %18 = vector.broadcast %17 : vector<1x128xf32> to vector<8x128xf32>
    %19 = arith.addf %16, %18 : vector<8x128xf32>
    %cst_17 = arith.constant 0.000000e+00 : f32
    %20 = vector.broadcast %cst_17 : f32 to vector<8x128xf32>
    %21 = arith.maximumf %19, %20 : vector<8x128xf32>
    %c0_18 = arith.constant 0 : index
    %c0_19 = arith.constant 0 : index
    %22 = vector.load %arg8[%c0_18, %c0_19] : memref<128x128xf32, #tpu.memory_space<vmem>>, vector<128x128xf32>
    %cst_20 = arith.constant dense<0.000000e+00> : vector<8x128xf32>
    %23 = tpu.matmul %21, %22, %cst_20 {dimension_numbers = #tpu.dot_dimension_numbers<[1], [0], [0], [1], [0, 0, 1, 1], [], []>} : vector<8x128xf32>, vector<128x128xf32>, vector<8x128xf32> -> vector<8x128xf32>
    %c0_21 = arith.constant 0 : index
    %c0_22 = arith.constant 0 : index
    %24 = vector.load %arg9[%c0_21, %c0_22] : memref<1x128xf32, #tpu.memory_space<vmem>>, vector<1x128xf32>
    %25 = vector.broadcast %24 : vector<1x128xf32> to vector<8x128xf32>
    %26 = arith.addf %23, %25 : vector<8x128xf32>
    %c0_23 = arith.constant 0 : index
    %c0_24 = arith.constant 0 : index
    %27 = vector.load %arg10[%c0_23, %c0_24] : memref<8x128xf32, #tpu.memory_space<vmem>>, vector<8x128xf32>
    tpu.vector_store %arg10[%c0_23, %c0_24], %26 {strides = array<i32>} : memref<8x128xf32, #tpu.memory_space<vmem>>, vector<8x128xf32>,
    return
  }
  func.func @transform_0(%arg0: i32) -> (i32, i32) {
    %c0_i32 = arith.constant 0 : i32
    %c0_i32_0 = arith.constant 0 : i32
    return %arg0, %c0_i32 : i32, i32
  }
  func.func @transform_1(%arg0: i32) -> (i32, i32) {
    %c0_i32 = arith.constant 0 : i32
    %c0_i32_0 = arith.constant 0 : i32
    %c0_i32_1 = arith.constant 0 : i32
    return %c0_i32, %c0_i32_0 : i32, i32
  }
  func.func @transform_2(%arg0: i32) -> (i32, i32) {
    %c0_i32 = arith.constant 0 : i32
    %c0_i32_0 = arith.constant 0 : i32
    %c0_i32_1 = arith.constant 0 : i32
    return %c0_i32, %c0_i32_0 : i32, i32
  }
  func.func @transform_3(%arg0: i32) -> (i32, i32) {
    %c0_i32 = arith.constant 0 : i32
    %c0_i32_0 = arith.constant 0 : i32
    %c0_i32_1 = arith.constant 0 : i32
    return %c0_i32, %c0_i32_0 : i32, i32
  }
  func.func @transform_4(%arg0: i32) -> (i32, i32) {
    %c0_i32 = arith.constant 0 : i32
    %c0_i32_0 = arith.constant 0 : i32
    %c0_i32_1 = arith.constant 0 : i32
    return %c0_i32, %c0_i32_0 : i32, i32
  }
  func.func @transform_5(%arg0: i32) -> (i32, i32) {
    %c0_i32 = arith.constant 0 : i32
    %c0_i32_0 = arith.constant 0 : i32
    %c0_i32_1 = arith.constant 0 : i32
    return %c0_i32, %c0_i32_0 : i32, i32
  }
  func.func @transform_6(%arg0: i32) -> (i32, i32) {
    %c0_i32 = arith.constant 0 : i32
    %c0_i32_0 = arith.constant 0 : i32
    %c0_i32_1 = arith.constant 0 : i32
    return %c0_i32, %c0_i32_0 : i32, i32
  }
  func.func @transform_7(%arg0: i32) -> (i32, i32) {
    %c0_i32 = arith.constant 0 : i32
    %c0_i32_0 = arith.constant 0 : i32
    %c0_i32_1 = arith.constant 0 : i32
    return %c0_i32, %c0_i32_0 : i32, i32
  }
  func.func @transform_8(%arg0: i32) -> (i32, i32) {
    %c0_i32 = arith.constant 0 : i32
    %c0_i32_0 = arith.constant 0 : i32
    %c0_i32_1 = arith.constant 0 : i32
    return %c0_i32, %c0_i32_0 : i32, i32
  }
  func.func @transform_9(%arg0: i32) -> (i32, i32) {
    %c0_i32 = arith.constant 0 : i32
    %c0_i32_0 = arith.constant 0 : i32
    return %arg0, %c0_i32 : i32, i32
  }
}

</mosaic_0001>

<bundles_post_ra>
// kernel: net_forward.1
= control target key start
LH: loop header
LB: loop body
LE: loop exit
PB: predicated region body
PF: predicated region fallthrough
CT: control target
= control target key end

     0   :  { %v995_v3 = vmov 0.0   ;;  %vm63_vm0 = vcmask 130048   ;;  %vm997_vm1 = vmmov 0   ;;  %s1646_s1 = inlined_call_operand.vmem [shape: f32[16,512], index: 1, kind: input, shape index: {}]   ;;  %s1647_s0 = inlined_call_operand.vmem [shape: f32[8,16], index: 0, kind: input, shape index: {}]   ;;  %s1648_s3 = inlined_call_operand.vmem [shape: f32[512,256], index: 3, kind: input, shape index: {}]   ;;  %s1649_s5 = inlined_call_operand.vmem [shape: f32[256,128], index: 5, kind: input, shape index: {}]   ;;  %s1650_s2 = inlined_call_operand.vmem [shape: f32[1,512], index: 2, kind: input, shape index: {}]   ;;  %s1651_s4 = inlined_call_operand.vmem [shape: f32[1,256], index: 4, kind: input, shape index: {}]   ;;  %s1652_s7 = inlined_call_operand.vmem [shape: f32[128,128], index: 7, kind: input, shape index: {}]   ;;  %s1653_s6 = inlined_call_operand.vmem [shape: f32[1,128], index: 6, kind: input, shape index: {}]   ;;  %s1654_s8 = inlined_call_operand.vmem [shape: f32[1,128], index: 8, kind: input, shape index: {}]   ;;  %s1655_s9 = inlined_call_operand.vmem [shape: f32[8,128], index: 9, kind: output, shape index: {}]  }
   0x1   :  { %v34_v0 = vld [vmem:[%s1646_s1 + $0x8] sm:$0xff]  ;;  %v33_v2 = vld [vmem:[%s1646_s1] sm:$0xff]  ;;  %131 = vmatprep.mubr.f32.mxu1 %v995_v3  ;;  %v36_v6 = vld [vmem:[%s1646_s1 + $0x18] sm:$0xff] }
   0x2   :  { %v38_v1 = vld [vmem:[%s1646_s1 + $0x28] sm:$0xff]  ;;  %v37_v5 = vld [vmem:[%s1646_s1 + $0x20] sm:$0xff]  ;;  %v40_v9 = vld [vmem:[%s1646_s1 + $0x38] sm:$0xff] }
   0x3   :  { %v796_v4 = vpack.c.bf16 %v38_v1, %v34_v0  ;;  %v798_v7 = vpack.c.bf16 %v37_v5, %v33_v2  ;;  %v32_v8 = vld [vmem:[%s1647_s0] sm:$0xff]  ;;  %v35_v10 = vld [vmem:[%s1646_s1 + $0x10] sm:$0xff]  ;;  %v800_v12 = vpack.c.bf16 %v40_v9, %v36_v6  ;;  %v214_v13 = vld [vmem:[%s1648_s3 + $0x8] sm:$0xff] }
   0x4   :  { %v39_v11 = vld [vmem:[%s1646_s1 + $0x30] sm:$0xff]  ;;  %v216_v14 = vld [vmem:[%s1648_s3 + $0x18] sm:$0xff]  ;;  %v213_v15 = vld [vmem:[%s1648_s3] sm:$0xff] }
   0x5   :  { %797 = vmatprep.subr.bf16.mxu1 %v796_v4  ;;  %v802_v16 = vpack.c.bf16 %v39_v11, %v35_v10  ;;  %v804_v17 = vpack.c.bf16 %v216_v14, %v214_v13  ;;  %v215_v18 = vld [vmem:[%s1648_s3 + $0x10] sm:$0xff]  ;;  %v218_v19 = vld [vmem:[%s1648_s3 + $0x28] sm:$0xff]  ;;  %v220_v20 = vld [vmem:[%s1648_s3 + $0x38] sm:$0xff] }
   0x6   :  { %799 = vmatpush1.bf16.msra.mxu1 %v798_v7  ;;  %v806_v21 = vpack.c.bf16 %v215_v18, %v213_v15  ;;  %v808_v22 = vpack.c.bf16 %v220_v20, %v218_v19  ;;  %v217_v23 = vld [vmem:[%s1648_s3 + $0x20] sm:$0xff]  ;;  %v219_v24 = vld [vmem:[%s1648_s3 + $0x30] sm:$0xff]  ;;  %v222_v25 = vld [vmem:[%s1648_s3 + $0x48] sm:$0xff] }
   0x7   :  { %801 = vmatprep.subr.bf16.mxu1 %v800_v12  ;;  %805 = vmatprep.subr.bf16.mxu0 %v804_v17  ;;  %v224_v26 = vld [vmem:[%s1648_s3 + $0x58] sm:$0xff]  ;;  %v810_v27 = vpack.c.bf16 %v219_v24, %v217_v23  ;;  %v221_v29 = vld [vmem:[%s1648_s3 + $0x40] sm:$0xff]  ;;  %v223_v30 = vld [vmem:[%s1648_s3 + $0x50] sm:$0xff] }
   0x8   :  { %807 = vmatpush1.bf16.msra.mxu0 %v806_v21  ;;  %v812_v28 = vpack.c.bf16 %v224_v26, %v222_v25  ;;  %v226_v31 = vld [vmem:[%s1648_s3 + $0x68] sm:$0xff]  ;;  %v228_v32 = vld [vmem:[%s1648_s3 + $0x78] sm:$0xff]  ;;  %v814_v33 = vpack.c.bf16 %v223_v30, %v221_v29  ;;  %v225_v35 = vld [vmem:[%s1648_s3 + $0x60] sm:$0xff] }
   0x9   :  { %705 = vmatmul.mubr.msk.f32.vlgmr.msra.gmra.mrb[0].mxu1 %vm63_vm0, %v32_v8  ;;  %809 = vmatprep.subr.bf16.mxu0 %v808_v22  ;;  %v816_v34 = vpack.c.bf16 %v228_v32, %v226_v31  ;;  %v227_v36 = vld [vmem:[%s1648_s3 + $0x70] sm:$0xff]  ;;  %v230_v37 = vld [vmem:[%s1648_s3 + $0x88] sm:$0xff]  ;;  %v232_v38 = vld [vmem:[%s1648_s3 + $0x98] sm:$0xff] }
   0xa   :  { %803 = vmatpush1.bf16.msra.mxu1 %v802_v16  ;;  %202 = vmatprep.mubr.f32.mxu1 %v995_v3  ;;  %v818_v39 = vpack.c.bf16 %v227_v36, %v225_v35  ;;  %v820_v40 = vpack.c.bf16 %v232_v38, %v230_v37  ;;  %v229_v41 = vld [vmem:[%s1648_s3 + $0x80] sm:$0xff]  ;;  %v231_v42 = vld [vmem:[%s1648_s3 + $0x90] sm:$0xff]  ;;  %v234_v43 = vld [vmem:[%s1648_s3 + $0xa8] sm:$0xff] }
   0xb   :  { %v236_v44 = vld [vmem:[%s1648_s3 + $0xb8] sm:$0xff]  ;;  %v822_v45 = vpack.c.bf16 %v231_v42, %v229_v41  ;;  %v233_v47 = vld [vmem:[%s1648_s3 + $0xa0] sm:$0xff]  ;;  %v235_v48 = vld [vmem:[%s1648_s3 + $0xb0] sm:$0xff] }
   0xc   :  { %811 = vmatpush1.bf16.msra.mxu0 %v810_v27  ;;  %v824_v46 = vpack.c.bf16 %v236_v44, %v234_v43  ;;  %v238_v49 = vld [vmem:[%s1648_s3 + $0xc8] sm:$0xff]  ;;  %v240_v50 = vld [vmem:[%s1648_s3 + $0xd8] sm:$0xff]  ;;  %v826_v51 = vpack.c.bf16 %v235_v48, %v233_v47  ;;  %v237_v53 = vld [vmem:[%s1648_s3 + $0xc0] sm:$0xff] }
   0xd   :  { %706 = vmatmul.mubr.msk.f32.vlgmr.msra.gmra.mrb[2].mxu1 %vm63_vm0, %v32_v8  ;;  %813 = vmatprep.subr.bf16.mxu0 %v812_v28  ;;  %v828_v52 = vpack.c.bf16 %v240_v50, %v238_v49  ;;  %v239_v54 = vld [vmem:[%s1648_s3 + $0xd0] sm:$0xff]  ;;  %v242_v55 = vld [vmem:[%s1648_s3 + $0xe8] sm:$0xff]  ;;  %v244_v56 = vld [vmem:[%s1648_s3 + $0xf8] sm:$0xff] }
   0xe   :  { %v830_v57 = vpack.c.bf16 %v239_v54, %v237_v53  ;;  %v832_v58 = vpack.c.bf16 %v244_v56, %v242_v55  ;;  %v241_v59 = vld [vmem:[%s1648_s3 + $0xe0] sm:$0xff]  ;;  %v243_v60 = vld [vmem:[%s1648_s3 + $0xf0] sm:$0xff]  ;;  %v246_v61 = vld [vmem:[%s1648_s3 + $0x108] sm:$0xff] }
   0xf   :  { %v248_v62 = vld [vmem:[%s1648_s3 + $0x118] sm:$0xff]  ;;  %v834_v63 = vpack.c.bf16 %v243_v60, %v241_v59  ;;  %v245_v1 = vld [vmem:[%s1648_s3 + $0x100] sm:$0xff]  ;;  %v247_v2 = vld [vmem:[%s1648_s3 + $0x110] sm:$0xff] }
  0x10   :  { %815 = vmatpush1.bf16.msra.mxu0 %v814_v33  ;;  %v836_v0 = vpack.c.bf16 %v248_v62, %v246_v61  ;;  %v250_v4 = vld [vmem:[%s1648_s3 + $0x128] sm:$0xff]  ;;  %v252_v5 = vld [vmem:[%s1648_s3 + $0x138] sm:$0xff]  ;;  %v838_v6 = vpack.c.bf16 %v247_v2, %v245_v1  ;;  %v249_v8 = vld [vmem:[%s1648_s3 + $0x120] sm:$0xff] }
  0x11   :  { %817 = vmatprep.subr.bf16.mxu0 %v816_v34  ;;  %v840_v7 = vpack.c.bf16 %v252_v5, %v250_v4  ;;  %v251_v9 = vld [vmem:[%s1648_s3 + $0x130] sm:$0xff]  ;;  %v254_v10 = vld [vmem:[%s1648_s3 + $0x148] sm:$0xff]  ;;  %v256_v11 = vld [vmem:[%s1648_s3 + $0x158] sm:$0xff] }
  0x12   :  { %v842_v12 = vpack.c.bf16 %v251_v9, %v249_v8  ;;  %v844_v13 = vpack.c.bf16 %v256_v11, %v254_v10  ;;  %v253_v14 = vld [vmem:[%s1648_s3 + $0x140] sm:$0xff]  ;;  %v255_v15 = vld [vmem:[%s1648_s3 + $0x150] sm:$0xff]  ;;  %v258_v16 = vld [vmem:[%s1648_s3 + $0x168] sm:$0xff] }
  0x13   :  { %v260_v17 = vld [vmem:[%s1648_s3 + $0x178] sm:$0xff]  ;;  %v846_v18 = vpack.c.bf16 %v255_v15, %v253_v14  ;;  %v257_v20 = vld [vmem:[%s1648_s3 + $0x160] sm:$0xff]  ;;  %v259_v21 = vld [vmem:[%s1648_s3 + $0x170] sm:$0xff] }
  0x14   :  { %819 = vmatpush1.bf16.msra.mxu0 %v818_v39  ;;  %v848_v19 = vpack.c.bf16 %v260_v17, %v258_v16  ;;  %v262_v22 = vld [vmem:[%s1648_s3 + $0x188] sm:$0xff]  ;;  %v264_v23 = vld [vmem:[%s1648_s3 + $0x198] sm:$0xff]  ;;  %v850_v24 = vpack.c.bf16 %v259_v21, %v257_v20  ;;  %v261_v26 = vld [vmem:[%s1648_s3 + $0x180] sm:$0xff] }
  0x15   :  { %821 = vmatprep.subr.bf16.mxu0 %v820_v40  ;;  %v852_v25 = vpack.c.bf16 %v264_v23, %v262_v22  ;;  %v263_v27 = vld [vmem:[%s1648_s3 + $0x190] sm:$0xff]  ;;  %v266_v28 = vld [vmem:[%s1648_s3 + $0x1a8] sm:$0xff]  ;;  %v268_v29 = vld [vmem:[%s1648_s3 + $0x1b8] sm:$0xff] }
  0x16   :  { %v854_v30 = vpack.c.bf16 %v263_v27, %v261_v26  ;;  %v856_v31 = vpack.c.bf16 %v268_v29, %v266_v28  ;;  %v265_v32 = vld [vmem:[%s1648_s3 + $0x1a0] sm:$0xff]  ;;  %v267_v33 = vld [vmem:[%s1648_s3 + $0x1b0] sm:$0xff]  ;;  %v270_v34 = vld [vmem:[%s1648_s3 + $0x1c8] sm:$0xff]  ;;  %v43_v26 = vlaneseq }
  0x17   :  { %v272_v35 = vld [vmem:[%s1648_s3 + $0x1d8] sm:$0xff]  ;;  %v858_v36 = vpack.c.bf16 %v267_v33, %v265_v32  ;;  %v269_v38 = vld [vmem:[%s1648_s3 + $0x1c0] sm:$0xff]  ;;  %v271_v39 = vld [vmem:[%s1648_s3 + $0x1d0] sm:$0xff] }
  0x18   :  { %823 = vmatpush1.bf16.msra.mxu0 %v822_v45  ;;  %v860_v37 = vpack.c.bf16 %v272_v35, %v270_v34  ;;  %v862_v40 = vpack.c.bf16 %v271_v39, %v269_v38  ;;  %v274_v41 = vld [vmem:[%s1648_s3 + $0x1e8] sm:$0xff]  ;;  %v276_v42 = vld [vmem:[%s1648_s3 + $0x1f8] sm:$0xff]  ;;  %v273_v44 = vld [vmem:[%s1648_s3 + $0x1e0] sm:$0xff]  ;;  %v1355_v27 = vshrl.u32 %v43_v26, 7 }
  0x19   :  { %825 = vmatprep.subr.bf16.mxu0 %v824_v46  ;;  %v864_v43 = vpack.c.bf16 %v276_v42, %v274_v41  ;;  %v275_v45 = vld [vmem:[%s1648_s3 + $0x1f0] sm:$0xff]  ;;  %v278_v47 = vld [vmem:[%s1648_s3 + $0x208] sm:$0xff]  ;;  %v280_v48 = vld [vmem:[%s1648_s3 + $0x218] sm:$0xff] }
  0x1a   :  { %v866_v46 = vpack.c.bf16 %v275_v45, %v273_v44  ;;  %v868_v49 = vpack.c.bf16 %v280_v48, %v278_v47  ;;  %v513_v50 = vld [vmem:[%s1649_s5 + $0x80] sm:$0xff]  ;;  %v498_v54 = vld [vmem:[%s1649_s5 + $0x8] sm:$0xff]  ;;  %v515_v55 = vld [vmem:[%s1649_s5 + $0x90] sm:$0xff]  ;;  %v45_v28 = vsub.s32 0, %v1355_v27  ;;  %v57_v33 = vsub.s32 3, %v1355_v27 }
  0x1b   :  { %v516_v56 = vld [vmem:[%s1649_s5 + $0x98] sm:$0xff]  ;;  %v499_v59 = vld [vmem:[%s1649_s5 + $0x10] sm:$0xff]  ;;  %v517_v61 = vld [vmem:[%s1649_s5 + $0xa0] sm:$0xff] }
  0x1c   :  { %827 = vmatpush1.bf16.msra.mxu0 %v826_v51  ;;  %v514_v51 = vld [vmem:[%s1649_s5 + $0x88] sm:$0xff]  ;;  %v500_v60 = vld [vmem:[%s1649_s5 + $0x18] sm:$0xff]  ;;  %v501_v1 = vld [vmem:[%s1649_s5 + $0x20] sm:$0xff] }
  0x1d   :  { %829 = vmatprep.subr.bf16.mxu0 %v828_v52  ;;  %v497_v52 = vld [vmem:[%s1649_s5] sm:$0xff]  ;;  %v932_v53 = vpack.c.bf16 %v514_v51, %v513_v50  ;;  %v518_v62 = vld [vmem:[%s1649_s5 + $0xa8] sm:$0xff]  ;;  %v519_v4 = vld [vmem:[%s1649_s5 + $0xb0] sm:$0xff] }
  0x1e   :  { %v502_v2 = vld [vmem:[%s1649_s5 + $0x28] sm:$0xff]  ;;  %v520_v5 = vld [vmem:[%s1649_s5 + $0xb8] sm:$0xff]  ;;  %v503_v8 = vld [vmem:[%s1649_s5 + $0x30] sm:$0xff] }
  0x1f   :  { %933 = vmatprep.subr.bf16.mxu1 %v932_v53  ;;  %v504_v9 = vld [vmem:[%s1649_s5 + $0x38] sm:$0xff]  ;;  %v521_v10 = vld [vmem:[%s1649_s5 + $0xc0] sm:$0xff]  ;;  %v522_v11 = vld [vmem:[%s1649_s5 + $0xc8] sm:$0xff] }
  0x20   :  { %831 = vmatpush1.bf16.msra.mxu0 %v830_v57  ;;  %v934_v57 = vpack.c.bf16 %v498_v54, %v497_v52  ;;  %v505_v14 = vld [vmem:[%s1649_s5 + $0x40] sm:$0xff]  ;;  %v506_v15 = vld [vmem:[%s1649_s5 + $0x48] sm:$0xff]  ;;  %v523_v16 = vld [vmem:[%s1649_s5 + $0xd0] sm:$0xff] }
  0x21   :  { %833 = vmatprep.subr.bf16.mxu0 %v832_v58  ;;  %v936_v58 = vpack.c.bf16 %v516_v56, %v515_v55  ;;  %v524_v17 = vld [vmem:[%s1649_s5 + $0xd8] sm:$0xff]  ;;  %v507_v20 = vld [vmem:[%s1649_s5 + $0x50] sm:$0xff]  ;;  %v525_v22 = vld [vmem:[%s1649_s5 + $0xe0] sm:$0xff] }
  0x22   :  { %935 = vmatpush3.bf16.msra.mxu1 %v934_v57  ;;  %v508_v21 = vld [vmem:[%s1649_s5 + $0x58] sm:$0xff]  ;;  %v526_v23 = vld [vmem:[%s1649_s5 + $0xe8] sm:$0xff]  ;;  %v1361_v29 = vld [vmem:[%s1650_s2] sm:$0xf] }
  0x23   :  { %937 = vmatprep.subr.bf16.mxu1 %v936_v58  ;;  %v279_v38 = vld [vmem:[%s1648_s3 + $0x210] sm:$0xff]  ;;  %v284_v41 = vld [vmem:[%s1648_s3 + $0x238] sm:$0xff]  ;;  %v58_v42 = vrot.slane %v1361_v29, %v57_v33  ;;  %v281_v48 = vld [vmem:[%s1648_s3 + $0x220] sm:$0xff] }
  0x24   :  { %835 = vmatpush1.bf16.msra.mxu0 %v834_v63  ;;  %v938_v63 = vpack.c.bf16 %v500_v60, %v499_v59  ;;  %v286_v51 = vld [vmem:[%s1648_s3 + $0x248] sm:$0xff]  ;;  %v288_v52 = vld [vmem:[%s1648_s3 + $0x258] sm:$0xff]  ;;  %v285_v57 = vld [vmem:[%s1648_s3 + $0x240] sm:$0xff] }
  0x25   :  { %837 = vmatprep.subr.bf16.mxu0 %v836_v0  ;;  %v940_v0 = vpack.c.bf16 %v518_v62, %v517_v61  ;;  %v876_v56 = vpack.c.bf16 %v288_v52, %v286_v51  ;;  %v287_v58 = vld [vmem:[%s1648_s3 + $0x250] sm:$0xff]  ;;  %v290_v59 = vld [vmem:[%s1648_s3 + $0x268] sm:$0xff]  ;;  %v292_v60 = vld [vmem:[%s1648_s3 + $0x278] sm:$0xff] }
  0x26   :  { %939 = vmatpush3.bf16.msra.mxu1 %v938_v63  ;;  %v878_v61 = vpack.c.bf16 %v287_v58, %v285_v57  ;;  %v880_v62 = vpack.c.bf16 %v292_v60, %v290_v59  ;;  %v289_v63 = vld [vmem:[%s1648_s3 + $0x260] sm:$0xff]  ;;  %v310_v26 = vld [vmem:[%s1648_s3 + $0x308] sm:$0xff]  ;;  %v327_v60 = vld [vmem:[%s1648_s3 + $0x390] sm:$0xff] }
  0x27   :  { %941 = vmatprep.subr.bf16.mxu1 %v940_v0  ;;  %v291_v0 = vld [vmem:[%s1648_s3 + $0x270] sm:$0xff]  ;;  %v325_v59 = vld [vmem:[%s1648_s3 + $0x380] sm:$0xff] }
  0x28   :  { %839 = vmatpush1.bf16.msra.mxu0 %v838_v6  ;;  %v942_v6 = vpack.c.bf16 %v502_v2, %v501_v1  ;;  %v294_v1 = vld [vmem:[%s1648_s3 + $0x288] sm:$0xff]  ;;  %v296_v2 = vld [vmem:[%s1648_s3 + $0x298] sm:$0xff] }
  0x29   :  { %841 = vmatprep.subr.bf16.mxu0 %v840_v7  ;;  %v944_v7 = vpack.c.bf16 %v520_v5, %v519_v4  ;;  %v882_v4 = vpack.c.bf16 %v291_v0, %v289_v63  ;;  %v884_v5 = vpack.c.bf16 %v296_v2, %v294_v1  ;;  %v918_v63 = vpack.c.bf16 %v327_v60, %v325_v59  ;;  %v329_v1 = vld [vmem:[%s1648_s3 + $0x3a0] sm:$0xff]  ;;  %v331_v2 = vld [vmem:[%s1648_s3 + $0x3b0] sm:$0xff]  ;;  %v620_v59 = vld [vmem:[%s1652_s7 + $0x68] sm:$0xff] }
  0x2a   :  { %943 = vmatpush3.bf16.msra.mxu1 %v942_v6  ;;  %v293_v6 = vld [vmem:[%s1648_s3 + $0x280] sm:$0xff] }
  0x2b   :  { %945 = vmatprep.subr.bf16.mxu1 %v944_v7  ;;  %v295_v7 = vld [vmem:[%s1648_s3 + $0x290] sm:$0xff] }
  0x2c   :  { %843 = vmatpush1.bf16.msra.mxu0 %v842_v12  ;;  %v946_v12 = vpack.c.bf16 %v504_v9, %v503_v8  ;;  %v298_v8 = vld [vmem:[%s1648_s3 + $0x2a8] sm:$0xff]  ;;  %v300_v9 = vld [vmem:[%s1648_s3 + $0x2b8] sm:$0xff] }
  0x2d   :  { %845 = vmatprep.subr.bf16.mxu0 %v844_v13  ;;  %v948_v13 = vpack.c.bf16 %v522_v11, %v521_v10  ;;  %v886_v10 = vpack.c.bf16 %v295_v7, %v293_v6  ;;  %v888_v11 = vpack.c.bf16 %v300_v9, %v298_v8  ;;  %v922_v6 = vpack.c.bf16 %v331_v2, %v329_v1  ;;  %v333_v9 = vld [vmem:[%s1648_s3 + $0x3c0] sm:$0xff] }
  0x2e   :  { %947 = vmatpush3.bf16.msra.mxu1 %v946_v12  ;;  %v297_v12 = vld [vmem:[%s1648_s3 + $0x2a0] sm:$0xff]  ;;  %v53_v7 = vsub.s32 2, %v1355_v27 }
  0x2f   :  { %949 = vmatprep.subr.bf16.mxu1 %v948_v13  ;;  %v299_v13 = vld [vmem:[%s1648_s3 + $0x2b0] sm:$0xff]  ;;  %v707_v1 = vld [vmem:[%s1653_s6] ss:$0 sm:$0xff] }
  0x30   :  { %847 = vmatpush1.bf16.msra.mxu0 %v846_v18  ;;  %v950_v18 = vpack.c.bf16 %v506_v15, %v505_v14  ;;  %v302_v14 = vld [vmem:[%s1648_s3 + $0x2c8] sm:$0xff]  ;;  %v304_v15 = vld [vmem:[%s1648_s3 + $0x2d8] sm:$0xff] }
  0x31   :  { %849 = vmatprep.subr.bf16.mxu0 %v848_v19  ;;  %v952_v19 = vpack.c.bf16 %v524_v17, %v523_v16  ;;  %v890_v16 = vpack.c.bf16 %v299_v13, %v297_v12  ;;  %v892_v17 = vpack.c.bf16 %v304_v15, %v302_v14  ;;  %v340_v12 = vld [vmem:[%s1648_s3 + $0x3f8] sm:$0xff]  ;;  %v54_v14 = vrot.slane %v1361_v29, %v53_v7  ;;  %v708_v7 = vld [vmem:[%s1654_s8] ss:$0 sm:$0xff] }
  0x32   :  { %951 = vmatpush3.bf16.msra.mxu1 %v950_v18  ;;  %v301_v18 = vld [vmem:[%s1648_s3 + $0x2c0] sm:$0xff] }
  0x33   :  { %953 = vmatprep.subr.bf16.mxu1 %v952_v19  ;;  %v303_v19 = vld [vmem:[%s1648_s3 + $0x2d0] sm:$0xff] }
  0x34   :  { %851 = vmatpush1.bf16.msra.mxu0 %v850_v24  ;;  %v954_v24 = vpack.c.bf16 %v508_v21, %v507_v20  ;;  %v306_v20 = vld [vmem:[%s1648_s3 + $0x2e8] sm:$0xff]  ;;  %v308_v21 = vld [vmem:[%s1648_s3 + $0x2f8] sm:$0xff] }
  0x35   :  { %853 = vmatprep.subr.bf16.mxu0 %v852_v25  ;;  %v956_v25 = vpack.c.bf16 %v526_v23, %v525_v22  ;;  %v894_v22 = vpack.c.bf16 %v303_v19, %v301_v18  ;;  %v896_v23 = vpack.c.bf16 %v308_v21, %v306_v20  ;;  %v510_v21 = vld [vmem:[%s1649_s5 + $0x68] sm:$0xff] }
  0x36   :  { %955 = vmatpush3.bf16.msra.mxu1 %v954_v24  ;;  %v305_v24 = vld [vmem:[%s1648_s3 + $0x2e0] sm:$0xff] }
  0x37   :  { %957 = vmatprep.subr.bf16.mxu1 %v956_v25  ;;  %v307_v25 = vld [vmem:[%s1648_s3 + $0x2f0] sm:$0xff] }
  0x38   :  { %855 = vmatpush1.bf16.msra.mxu0 %v854_v30  ;;  %v49_v30 = vsub.s32 1, %v1355_v27  ;;  %v609_v27 = vld [vmem:[%s1652_s7 + $0x10] sm:$0xff] }
  0x39   :  { %857 = vmatprep.subr.bf16.mxu0 %v856_v31  ;;  %v46_v31 = vrot.slane %v1361_v29, %v45_v28 }
  0x3a   :  { %v50_v32 = vrot.slane %v1361_v29, %v49_v30  ;;  %v509_v29 = vld [vmem:[%s1649_s5 + $0x60] sm:$0xff] }
  0x3c   :  { %859 = vmatpush1.bf16.msra.mxu0 %v858_v36 }
  0x3d   :  { %861 = vmatprep.subr.bf16.mxu0 %v860_v37  ;;  %v277_v37 = vld [vmem:[%s1648_s3 + $0x200] sm:$0xff] }
  0x3e   :  { %v870_v44 = vpack.c.bf16 %v279_v38, %v277_v37  ;;  %v316_v37 = vld [vmem:[%s1648_s3 + $0x338] sm:$0xff] }
  0x40   :  { %863 = vmatpush1.bf16.msra.mxu0 %v862_v40  ;;  %v282_v40 = vld [vmem:[%s1648_s3 + $0x228] sm:$0xff] }
  0x41   :  { %865 = vmatprep.subr.bf16.mxu0 %v864_v43  ;;  %v872_v47 = vpack.c.bf16 %v284_v41, %v282_v40  ;;  %v313_v40 = vld [vmem:[%s1648_s3 + $0x320] sm:$0xff]  ;;  %v315_v41 = vld [vmem:[%s1648_s3 + $0x330] sm:$0xff] }
  0x44   :  { %867 = vmatpush1.bf16.msra.mxu0 %v866_v46 }
  0x45   :  { %869 = vmatprep.subr.bf16.mxu0 %v868_v49  ;;  %v283_v49 = vld [vmem:[%s1648_s3 + $0x230] sm:$0xff] }
  0x46   :  { %v874_v54 = vpack.c.bf16 %v283_v49, %v281_v48  ;;  %v319_v48 = vld [vmem:[%s1648_s3 + $0x350] sm:$0xff]  ;;  %v322_v49 = vld [vmem:[%s1648_s3 + $0x368] sm:$0xff] }
  0xdc   :  { %v133_v34 = vpop.f32.mrb[0].mxu1 }
  0xdd   :  { %v134_v35 = vadd.f32 %v133_v34, %v46_v31  ;;  %v135_v36 = vpop.f32.mrb[1].mxu1  ;;  %v312_v31 = vld [vmem:[%s1648_s3 + $0x318] sm:$0xff]  ;;  %v309_v34 = vld [vmem:[%s1648_s3 + $0x300] sm:$0xff] }
  0xde   :  { %v136_v39 = vadd.f32 %v135_v36, %v50_v32  ;;  %v898_v32 = vpack.c.bf16 %v307_v25, %v305_v24  ;;  %v900_v33 = vpack.c.bf16 %v312_v31, %v310_v26  ;;  %v314_v36 = vld [vmem:[%s1648_s3 + $0x328] sm:$0xff]  ;;  %v511_v25 = vld [vmem:[%s1649_s5 + $0x70] sm:$0xff]  ;;  %v512_v26 = vld [vmem:[%s1649_s5 + $0x78] sm:$0xff] }
  0xdf   :  { %v209_v46 = vmax.f32 %v134_v35, 0.0  ;;  %v311_v35 = vld [vmem:[%s1648_s3 + $0x310] sm:$0xff]  ;;  %v962_v31 = vpack.c.bf16 %v512_v26, %v511_v25 }
  0xe0   :  { %v210_v43 = vmax.f32 %v136_v39, 0.0  ;;  %v1384_v45 = vpop.f32.mrb[2].mxu1  ;;  %v902_v38 = vpack.c.bf16 %v311_v35, %v309_v34  ;;  %v904_v39 = vpack.c.bf16 %v316_v37, %v314_v36 }
  0xe1   :  { %v206_v50 = vpop.f32.mrb[3].mxu1  ;;  %v205_v19 = vadd.f32 %v1384_v45, %v54_v14  ;;  %v528_v45 = vld [vmem:[%s1649_s5 + $0xf8] sm:$0xff] }
  0xe2   :  { %417 = vmatprep.mubr.f32.mxu0 %v210_v43  ;;  %v207_v53 = vadd.f32 %v206_v50, %v58_v42  ;;  %v318_v42 = vld [vmem:[%s1648_s3 + $0x348] sm:$0xff]  ;;  %v320_v43 = vld [vmem:[%s1648_s3 + $0x358] sm:$0xff] }
  0xe3   :  { %418 = vmatmul.mubr.f32.vlgmr.msra.gmra.mrb[0].mxu0 %v209_v46  ;;  %v908_v46 = vpack.c.bf16 %v320_v43, %v318_v42  ;;  %v324_v50 = vld [vmem:[%s1648_s3 + $0x378] sm:$0xff]  ;;  %v211_v20 = vmax.f32 %v205_v19, 0.0 }
  0xe4   :  { %871 = vmatpush1.bf16.msra.mxu0 %v870_v44  ;;  %v212_v55 = vmax.f32 %v207_v53, 0.0  ;;  %v906_v44 = vpack.c.bf16 %v315_v41, %v313_v40  ;;  %v912_v52 = vpack.c.bf16 %v324_v50, %v322_v49  ;;  %v321_v53 = vld [vmem:[%s1648_s3 + $0x360] sm:$0xff]  ;;  %v608_v40 = vld [vmem:[%s1652_s7 + $0x8] sm:$0xff]  ;;  %v613_v49 = vld [vmem:[%s1652_s7 + $0x30] sm:$0xff] }
  0xe5   :  { %873 = vmatprep.subr.bf16.mxu0 %v872_v47  ;;  %v317_v47 = vld [vmem:[%s1648_s3 + $0x340] sm:$0xff]  ;;  %v614_v50 = vld [vmem:[%s1652_s7 + $0x38] sm:$0xff] }
  0xe6   :  { %488 = vmatprep.mubr.f32.mxu0 %v212_v55  ;;  %v910_v51 = vpack.c.bf16 %v319_v48, %v317_v47  ;;  %v326_v55 = vld [vmem:[%s1648_s3 + $0x388] sm:$0xff] }
  0xe7   :  { %v612_v47 = vld [vmem:[%s1652_s7 + $0x28] sm:$0xff] }
  0xe8   :  { %875 = vmatpush1.bf16.msra.mxu0 %v874_v54  ;;  %v323_v54 = vld [vmem:[%s1648_s3 + $0x370] sm:$0xff] }
  0xe9   :  { %877 = vmatprep.subr.bf16.mxu0 %v876_v56  ;;  %v328_v56 = vld [vmem:[%s1648_s3 + $0x398] sm:$0xff]  ;;  %v914_v57 = vpack.c.bf16 %v323_v54, %v321_v53  ;;  %v616_v53 = vld [vmem:[%s1652_s7 + $0x48] sm:$0xff] }
  0xea   :  { %v916_v58 = vpack.c.bf16 %v328_v56, %v326_v55  ;;  %v617_v55 = vld [vmem:[%s1652_s7 + $0x50] sm:$0xff]  ;;  %v618_v56 = vld [vmem:[%s1652_s7 + $0x58] sm:$0xff] }
  0xec   :  { %879 = vmatpush1.bf16.msra.mxu0 %v878_v61  ;;  %v330_v61 = vld [vmem:[%s1648_s3 + $0x3a8] sm:$0xff] }
  0xed   :  { %881 = vmatprep.subr.bf16.mxu0 %v880_v62  ;;  %v332_v62 = vld [vmem:[%s1648_s3 + $0x3b8] sm:$0xff] }
  0xee   :  { %v920_v0 = vpack.c.bf16 %v332_v62, %v330_v61  ;;  %v621_v61 = vld [vmem:[%s1652_s7 + $0x70] sm:$0xff]  ;;  %v622_v62 = vld [vmem:[%s1652_s7 + $0x78] sm:$0xff] }
  0xf0   :  { %883 = vmatpush1.bf16.msra.mxu0 %v882_v4  ;;  %v334_v4 = vld [vmem:[%s1648_s3 + $0x3c8] sm:$0xff] }
  0xf1   :  { %885 = vmatprep.subr.bf16.mxu0 %v884_v5  ;;  %v336_v5 = vld [vmem:[%s1648_s3 + $0x3d8] sm:$0xff] }
  0xf2   :  { %v924_v8 = vpack.c.bf16 %v336_v5, %v334_v4 }
  0xf4   :  { %887 = vmatpush1.bf16.msra.mxu0 %v886_v10  ;;  %v335_v10 = vld [vmem:[%s1648_s3 + $0x3d0] sm:$0xff] }
  0xf5   :  { %889 = vmatprep.subr.bf16.mxu0 %v888_v11  ;;  %v338_v11 = vld [vmem:[%s1648_s3 + $0x3e8] sm:$0xff]  ;;  %v926_v13 = vpack.c.bf16 %v335_v10, %v333_v9 }
  0xf6   :  { %v928_v15 = vpack.c.bf16 %v340_v12, %v338_v11 }
  0xf8   :  { %891 = vmatpush1.bf16.msra.mxu0 %v890_v16  ;;  %v337_v16 = vld [vmem:[%s1648_s3 + $0x3e0] sm:$0xff] }
  0xf9   :  { %893 = vmatprep.subr.bf16.mxu0 %v892_v17  ;;  %v339_v17 = vld [vmem:[%s1648_s3 + $0x3f0] sm:$0xff] }
  0xfa   :  { %v930_v18 = vpack.c.bf16 %v339_v17, %v337_v16 }
  0xfc   :  { %895 = vmatpush1.bf16.msra.mxu0 %v894_v22  ;;  %v958_v22 = vpack.c.bf16 %v510_v21, %v509_v29 }
  0xfd   :  { %897 = vmatprep.subr.bf16.mxu0 %v896_v23  ;;  %v527_v23 = vld [vmem:[%s1649_s5 + $0xf0] sm:$0xff] }
  0xfe   :  { %959 = vmatpush3.bf16.msra.mxu1 %v958_v22  ;;  %v960_v24 = vpack.c.bf16 %v528_v45, %v527_v23 }
 0x100   :  { %899 = vmatpush1.bf16.msra.mxu0 %v898_v32  ;;  %961 = vmatprep.subr.bf16.mxu1 %v960_v24  ;;  %v996_v32 = vmov 0.0|0.0  }
 0x101   :  { %901 = vmatprep.subr.bf16.mxu0 %v900_v33  ;;  %v341_v33 = vld [vmem:[%s1651_s4] sm:$0x3] }
 0x102   :  { %963 = vmatpush3.bf16.msra.mxu1 %v962_v31  ;;  %v346_v34 = vrot.slane %v341_v33, %v45_v28  ;;  %v350_v35 = vrot.slane %v341_v33, %v49_v30  ;;  %v610_v28 = vld [vmem:[%s1652_s7 + $0x18] sm:$0xff] }
 0x103   :  { %964 = vmatprep.subr.bf16.mxu1 %v996_v32  ;;  %v968_v30 = vpack.c.bf16 %v610_v28, %v609_v27 }
 0x104   :  { %903 = vmatpush1.bf16.msra.mxu0 %v902_v38 }
 0x105   :  { %905 = vmatprep.subr.bf16.mxu0 %v904_v39  ;;  %v607_v39 = vld [vmem:[%s1652_s7] sm:$0xff] }
 0x106   :  { %v965_v43 = vpack.c.bf16 %v608_v40, %v607_v39 }
 0x108   :  { %907 = vmatpush1.bf16.msra.mxu0 %v906_v44 }
 0x109   :  { %909 = vmatprep.subr.bf16.mxu0 %v908_v46  ;;  %v611_v46 = vld [vmem:[%s1652_s7 + $0x20] sm:$0xff] }
 0x10a   :  { %v971_v48 = vpack.c.bf16 %v612_v47, %v611_v46 }
 0x10c   :  { %911 = vmatpush1.bf16.msra.mxu0 %v910_v51  ;;  %v974_v51 = vpack.c.bf16 %v614_v50, %v613_v49 }
 0x10d   :  { %913 = vmatprep.subr.bf16.mxu0 %v912_v52  ;;  %v615_v52 = vld [vmem:[%s1652_s7 + $0x40] sm:$0xff] }
 0x10e   :  { %v977_v54 = vpack.c.bf16 %v616_v53, %v615_v52 }
 0x110   :  { %915 = vmatpush1.bf16.msra.mxu0 %v914_v57  ;;  %v980_v57 = vpack.c.bf16 %v618_v56, %v617_v55 }
 0x111   :  { %917 = vmatprep.subr.bf16.mxu0 %v916_v58  ;;  %v619_v58 = vld [vmem:[%s1652_s7 + $0x60] sm:$0xff] }
 0x112   :  { %v983_v60 = vpack.c.bf16 %v620_v59, %v619_v58 }
 0x114   :  { %919 = vmatpush1.bf16.msra.mxu0 %v918_v63  ;;  %v986_v63 = vpack.c.bf16 %v622_v62, %v621_v61 }
 0x115   :  { %921 = vmatprep.subr.bf16.mxu0 %v920_v0 }
 0x118   :  { %923 = vmatpush1.bf16.msra.mxu0 %v922_v6 }
 0x119   :  { %925 = vmatprep.subr.bf16.mxu0 %v924_v8 }
 0x11c   :  { %927 = vmatpush1.bf16.msra.mxu0 %v926_v13 }
 0x11d   :  { %929 = vmatprep.subr.bf16.mxu0 %v928_v15 }
 0x120   :  { %931 = vmatpush1.bf16.msra.mxu0 %v930_v18 }
 0x123   :  { %489 = vmatmul.mubr.f32.vlgmr.msra.gmra.mrb[0].mxu0 %v211_v20 }
 0x1f6   :  { %v490_v36 = vpop.f32.mrb[0].mxu0 }
 0x1f7   :  { %v988_v37 = vadd.f32 %v490_v36, %v346_v34  ;;  %v492_v38 = vpop.f32.mrb[1].mxu0 }
 0x1f8   :  { %v989_v41 = vadd.f32 %v492_v38, %v350_v35 }
 0x1f9   :  { %v495_v44 = vmax.f32 %v988_v37, 0.0 }
 0x1fa   :  { %v496_v42 = vmax.f32 %v989_v41, 0.0 }
 0x1fc   :  { %600 = vmatprep.mubr.f32.mxu1 %v496_v42 }
 0x1fd   :  { %601 = vmatmul.mubr.f32.vlgmr.msra.gmra.mrb[4].mxu1 %v495_v44 }
 0x1fe   :  { %966 = vmatpush3.bf16.msra.mxu1 %v965_v43  ;;  %793 = vmatprep.mubr.msk.f32.mxu1 %vm997_vm1, %v995_v3 }
 0x1ff   :  { %967 = vmatprep.subr.bf16.mxu1 %v996_v32 }
 0x202   :  { %969 = vmatpush3.bf16.msra.mxu1 %v968_v30 }
 0x203   :  { %970 = vmatprep.subr.bf16.mxu1 %v996_v32 }
 0x206   :  { %972 = vmatpush3.bf16.msra.mxu1 %v971_v48 }
 0x207   :  { %973 = vmatprep.subr.bf16.mxu1 %v996_v32 }
 0x20a   :  { %975 = vmatpush3.bf16.msra.mxu1 %v974_v51 }
 0x20b   :  { %976 = vmatprep.subr.bf16.mxu1 %v996_v32 }
 0x20e   :  { %978 = vmatpush3.bf16.msra.mxu1 %v977_v54 }
 0x20f   :  { %979 = vmatprep.subr.bf16.mxu1 %v996_v32 }
 0x212   :  { %981 = vmatpush3.bf16.msra.mxu1 %v980_v57 }
 0x213   :  { %982 = vmatprep.subr.bf16.mxu1 %v996_v32 }
 0x216   :  { %984 = vmatpush3.bf16.msra.mxu1 %v983_v60 }
 0x217   :  { %985 = vmatprep.subr.bf16.mxu1 %v996_v32 }
 0x21a   :  { %987 = vmatpush3.bf16.msra.mxu1 %v986_v63 }
 0x2d0   :  { %v741_v0 = vpop.f32.mrb[4].mxu1 }
 0x2d1   :  { %v742_v2 = vpop.f32.mrb[5].mxu1 }
 0x2d2   :  { %v743_v4 = vadd.f32 %v742_v2, %v741_v0 }
 0x2d4   :  { %v603_v5 = vadd.f32 %v743_v4, %v707_v1 }
 0x2d6   :  { %v606_v6 = vmax.f32 %v603_v5, 0.0 }
 0x2d8   :  { %794 = vmatmul.mubr.f32.vlgmr.msra.gmra.mrb[6].mxu1 %v606_v6 }
 0x3ab   :  { %v696_v8 = vpop.f32.mrb[6].mxu1 }
 0x3ac   :  { %v697_v9 = vadd.f32 %v708_v7, %v696_v8  ;;  %v795_v10 = vpop.f32.mrb[7].mxu1 }
 0x3ae   :  { %700 = vst [vmem:[%s1655_s9] sm:$0xff] %v697_v9 }

</bundles_post_ra>
